<compile_context>
chip_gen: v7x
topology: tpu7x:2x2x1
jax: 0.10.0
libtpu: 0.0.40
codegen_flags: <defaults>
</compile_context>

<pallas_src>
import jax
import jax.numpy as jnp
from jax.experimental import pallas as pl
from jax.experimental.pallas import tpu as pltpu

LANE = 128            # TPU lane width — hidden dims padded to this (once, at init)
SUBLANE = 8           # f32 sublane quantum — batch tiles are multiples of this
MAX_BATCH_TILE = 2048  # rows per grid step; per-tile VMEM is only a few MiB


def _cdiv(a, b):
    return -(-a // b)


def _round_up(n, m):
    return ((n + m - 1) // m) * m


def _pad2d(a, rows, cols):
    return jnp.pad(a, ((0, rows - a.shape[0]), (0, cols - a.shape[1])))


def mlp_kernel(x_ref, w1_ref, b1_ref, w2_ref, b2_ref, w3t_ref, b3_ref, o_ref):
    """(Linear -> ReLU) x 3 on one batch tile; weights resident in VMEM.

    x_ref:   (tb, obs)      — un-padded input lanes
    w1_ref:  (obs, H1p)     b1_ref: (1, H1p)
    w2_ref:  (H1p, H2p)     b2_ref: (1, H2p)
    w3t_ref: (1, H2p)       b3_ref: (1, 1)
    o_ref:   (tb, 1)
    """
    obs = x_ref.shape[1]

    # Layer 1 (K = obs, tiny): VPU broadcast multiply-accumulate, no MXU / no zero-padded dot.
    h1 = x_ref[:, 0:1] * w1_ref[0:1, :]
    for j in range(1, obs):  # unrolled at trace time (obs is small & static)
        h1 = h1 + x_ref[:, j:j + 1] * w1_ref[j:j + 1, :]
    h1 = jnp.maximum(h1 + b1_ref[...], 0.0)

    # Layer 2: the only real matmul -> MXU.
    h2 = jnp.dot(h1, w2_ref[...], preferred_element_type=jnp.float32) + b2_ref[...]
    h2 = jnp.maximum(h2, 0.0)

    # Layer 3 (N = 1): VPU multiply + lane reduction instead of an MXU dot into a padded column.
    h3 = jnp.sum(h2 * w3t_ref[...], axis=-1, keepdims=True) + b3_ref[...]
    o_ref[...] = jnp.maximum(h3, 0.0).astype(o_ref.dtype)


def prepare_params(params):
    """Pad weights/biases once (lane-pad hidden dims; layer-3 weight stored as a row)."""
    w1, b1, w2, b2, w3, b3 = params
    h1_dim, h2_dim = w1.shape[1], w2.shape[1]
    h1_p = _round_up(h1_dim, LANE)
    h2_p = _round_up(h2_dim, LANE)
    w1_p = _pad2d(w1, w1.shape[0], h1_p)          # (obs, H1p)
    b1_p = _pad2d(b1, 1, h1_p)                    # (1, H1p)
    w2_p = _pad2d(w2, h1_p, h2_p)                 # (H1p, H2p)
    b2_p = _pad2d(b2, 1, h2_p)                    # (1, H2p)
    w3t_p = _pad2d(w3.T, 1, h2_p)                 # (1, H2p) — layer 3 as lane reduction
    b3_p = b3.reshape(1, 1)                       # (1, 1)
    return (w1_p, b1_p, w2_p, b2_p, w3t_p, b3_p)


@jax.jit
def net_forward(x, prep_params):
    """Pallas forward. x: [B, obs_size] float32, prep_params from prepare_params.
    Returns [B, 1] float32."""
    w1_p, b1_p, w2_p, b2_p, w3t_p, b3_p = prep_params
    B, obs = x.shape
    h1_p = w1_p.shape[1]
    h2_p = w2_p.shape[1]

    # Batch tiling: big tiles amortize per-step overhead; >=2 tiles (when B allows) so the
    # "parallel" axis actually uses both TensorCores on v7x; tb chosen to minimize padding.
    n_tiles = _cdiv(B, MAX_BATCH_TILE)
    if B >= 2 * SUBLANE:
        n_tiles = max(n_tiles, 2)
    tb = _round_up(_cdiv(B, n_tiles), SUBLANE)
    B_p = tb * n_tiles

    x_p = jnp.pad(x.astype(jnp.float32), ((0, B_p - B), (0, 0)))  # pad batch rows only

    def resident(shape):
        # Same (0, 0) block every grid step -> stays VMEM-resident, not re-fetched.
        return pl.BlockSpec(shape, lambda i: (0, 0))

    out_padded = pl.pallas_call(
        mlp_kernel,
        out_shape=jax.ShapeDtypeStruct((B_p, 1), jnp.float32),
        grid=(n_tiles,),
        in_specs=[
            pl.BlockSpec((tb, obs), lambda i: (i, 0)),   # x: tiled over batch, lanes un-padded
            resident((obs, h1_p)), resident((1, h1_p)),
            resident((h1_p, h2_p)), resident((1, h2_p)),
            resident((1, h2_p)), resident((1, 1)),
        ],
        out_specs=pl.BlockSpec((tb, 1), lambda i: (i, 0)),  # narrow output: no 128x writeback
        compiler_params=pltpu.CompilerParams(dimension_semantics=("parallel",)),
    )(x_p, w1_p, b1_p, w2_p, b2_p, w3t_p, b3_p)

    return out_padded[:B]  # drop batch padding; already [B, 1]


def init_params(key, obs_size, first_hidden, second_hidden):
    """PyTorch-style (Kaiming-uniform-ish) init; weights stored [in, out], biases [1, out]."""
    def linear_init(k, fan_in, fan_out):
        kw, kb = jax.random.split(k)
        bound = 1.0 / jnp.sqrt(fan_in)
        w = jax.random.uniform(kw, (fan_in, fan_out), jnp.float32, -bound, bound)
        b = jax.random.uniform(kb, (1, fan_out), jnp.float32, -bound, bound)
        return w, b

    k1, k2, k3 = jax.random.split(key, 3)
    w1, b1 = linear_init(k1, obs_size, first_hidden)
    w2, b2 = linear_init(k2, first_hidden, second_hidden)
    w3, b3 = linear_init(k3, second_hidden, 1)
    return (w1, b1, w2, b2, w3, b3)


def net_reference(x, params):
    """Plain-JAX reference of the PyTorch forward (ReLU after every Linear, incl. the last)."""
    w1, b1, w2, b2, w3, b3 = params
    h = jnp.maximum(x @ w1 + b1, 0.0)
    h = jnp.maximum(h @ w2 + b2, 0.0)
    return jnp.maximum(h @ w3 + b3, 0.0)


if __name__ == "__main__":
    obs_size = 2
    first_hidden = 32
    second_hidden = 32

    key = jax.random.PRNGKey(0)
    kx, kp, kx2 = jax.random.split(key, 3)
    params = init_params(kp, obs_size, first_hidden, second_hidden)
    prep = prepare_params(params)  # pad weights once, outside the forward

    # Small sanity-check batch (single grid step).
    x_small = jax.random.normal(kx, (8, obs_size), dtype=jnp.float32)
    out_small = jax.block_until_ready(net_forward(x_small, prep))
    ref_small = net_reference(x_small, params)
    assert out_small.shape == (8, 1), out_small.shape
    assert jnp.allclose(out_small, ref_small, atol=1e-5, rtol=1e-5), "small-batch mismatch"

    # Larger batch exercising multiple grid steps + batch padding (non-multiple of tile).
    x_big = jax.random.normal(kx2, (1000, obs_size), dtype=jnp.float32)
    out_big = jax.block_until_ready(net_forward(x_big, prep))
    ref_big = net_reference(x_big, params)
    assert out_big.shape == (1000, 1), out_big.shape
    assert jnp.allclose(out_big, ref_big, atol=1e-5, rtol=1e-5), "big-batch mismatch"

    print("KERNEL_OK")
</pallas_src>

<mosaic_0001>
module attributes {stable_mosaic.version = 11 : i64} {
  func.func @mlp_kernel(%arg0: i32, %arg1: memref<8x2xf32, #tpu.memory_space<vmem>>, %arg2: memref<2x128xf32, #tpu.memory_space<vmem>>, %arg3: memref<1x128xf32, #tpu.memory_space<vmem>>, %arg4: memref<128x128xf32, #tpu.memory_space<vmem>>, %arg5: memref<1x128xf32, #tpu.memory_space<vmem>>, %arg6: memref<1x128xf32, #tpu.memory_space<vmem>>, %arg7: memref<1x1xf32, #tpu.memory_space<vmem>>, %arg8: memref<8x1xf32, #tpu.memory_space<vmem>>) attributes {dimension_semantics = [#tpu.dimension_semantics<parallel>], iteration_bounds = array<i64: 1>, scalar_prefetch = 0 : i64, scratch_operands = 0 : i64, tpu.core_type = #tpu.core_type<tc>, window_params = [{transform_indices = @transform_0, window_bounds = array<i64: 8, 2>}, {pipeline_mode = #tpu.pipeline_mode<synchronous>, transform_indices = @transform_1, window_bounds = array<i64: 2, 128>}, {pipeline_mode = #tpu.pipeline_mode<synchronous>, transform_indices = @transform_2, window_bounds = array<i64: 1, 128>}, {pipeline_mode = #tpu.pipeline_mode<synchronous>, transform_indices = @transform_3, window_bounds = array<i64: 128, 128>}, {pipeline_mode = #tpu.pipeline_mode<synchronous>, transform_indices = @transform_4, window_bounds = array<i64: 1, 128>}, {pipeline_mode = #tpu.pipeline_mode<synchronous>, transform_indices = @transform_5, window_bounds = array<i64: 1, 128>}, {pipeline_mode = #tpu.pipeline_mode<synchronous>, transform_indices = @transform_6, window_bounds = array<i64: 1, 1>}, {transform_indices = @transform_7, window_bounds = array<i64: 8, 1>}]} {
    %c0 = arith.constant 0 : index
    %c0_0 = arith.constant 0 : index
    %0 = vector.load %arg1[%c0, %c0_0] : memref<8x2xf32, #tpu.memory_space<vmem>>, vector<8x1xf32>
    %c0_1 = arith.constant 0 : index
    %c0_2 = arith.constant 0 : index
    %1 = vector.load %arg2[%c0_1, %c0_2] : memref<2x128xf32, #tpu.memory_space<vmem>>, vector<1x128xf32>
    %2 = vector.broadcast %0 : vector<8x1xf32> to vector<8x128xf32>
    %3 = vector.broadcast %1 : vector<1x128xf32> to vector<8x128xf32>
    %4 = arith.mulf %2, %3 : vector<8x128xf32>
    %c0_3 = arith.constant 0 : index
    %c1 = arith.constant 1 : index
    %5 = vector.load %arg1[%c0_3, %c1] : memref<8x2xf32, #tpu.memory_space<vmem>>, vector<8x1xf32>
    %c1_4 = arith.constant 1 : index
    %c0_5 = arith.constant 0 : index
    %6 = vector.load %arg2[%c1_4, %c0_5] : memref<2x128xf32, #tpu.memory_space<vmem>>, vector<1x128xf32>
    %7 = vector.broadcast %5 : vector<8x1xf32> to vector<8x128xf32>
    %8 = vector.broadcast %6 : vector<1x128xf32> to vector<8x128xf32>
    %9 = arith.mulf %7, %8 : vector<8x128xf32>
    %10 = arith.addf %4, %9 : vector<8x128xf32>
    %c0_6 = arith.constant 0 : index
    %c0_7 = arith.constant 0 : index
    %11 = vector.load %arg3[%c0_6, %c0_7] : memref<1x128xf32, #tpu.memory_space<vmem>>, vector<1x128xf32>
    %12 = vector.broadcast %11 : vector<1x128xf32> to vector<8x128xf32>
    %13 = arith.addf %10, %12 : vector<8x128xf32>
    %cst = arith.constant 0.000000e+00 : f32
    %14 = vector.broadcast %cst : f32 to vector<8x128xf32>
    %15 = arith.maximumf %13, %14 : vector<8x128xf32>
    %c0_8 = arith.constant 0 : index
    %c0_9 = arith.constant 0 : index
    %16 = vector.load %arg4[%c0_8, %c0_9] : memref<128x128xf32, #tpu.memory_space<vmem>>, vector<128x128xf32>
    %cst_10 = arith.constant dense<0.000000e+00> : vector<8x128xf32>
    %17 = tpu.matmul %15, %16, %cst_10 {dimension_numbers = #tpu.dot_dimension_numbers<[1], [0], [0], [1], [0, 0, 1, 1], [], []>} : vector<8x128xf32>, vector<128x128xf32>, vector<8x128xf32> -> vector<8x128xf32>
    %c0_11 = arith.constant 0 : index
    %c0_12 = arith.constant 0 : index
    %18 = vector.load %arg5[%c0_11, %c0_12] : memref<1x128xf32, #tpu.memory_space<vmem>>, vector<1x128xf32>
    %19 = vector.broadcast %18 : vector<1x128xf32> to vector<8x128xf32>
    %20 = arith.addf %17, %19 : vector<8x128xf32>
    %cst_13 = arith.constant 0.000000e+00 : f32
    %21 = vector.broadcast %cst_13 : f32 to vector<8x128xf32>
    %22 = arith.maximumf %20, %21 : vector<8x128xf32>
    %c0_14 = arith.constant 0 : index
    %c0_15 = arith.constant 0 : index
    %23 = vector.load %arg6[%c0_14, %c0_15] : memref<1x128xf32, #tpu.memory_space<vmem>>, vector<1x128xf32>
    %24 = vector.broadcast %23 : vector<1x128xf32> to vector<8x128xf32>
    %25 = arith.mulf %22, %24 : vector<8x128xf32>
    %cst_16 = arith.constant dense<0.000000e+00> : vector<8xf32>
    %26 = vector.multi_reduction <add>, %25, %cst_16 [1] : vector<8x128xf32> to vector<8xf32>
    %27 = vector.shape_cast %26 : vector<8xf32> to vector<8x1xf32>
    %c0_17 = arith.constant 0 : index
    %c0_18 = arith.constant 0 : index
    %28 = vector.load %arg7[%c0_17, %c0_18] : memref<1x1xf32, #tpu.memory_space<vmem>>, vector<1x1xf32>
    %29 = vector.broadcast %28 : vector<1x1xf32> to vector<8x1xf32>
    %30 = arith.addf %27, %29 : vector<8x1xf32>
    %cst_19 = arith.constant 0.000000e+00 : f32
    %31 = vector.broadcast %cst_19 : f32 to vector<8x1xf32>
    %32 = arith.maximumf %30, %31 : vector<8x1xf32>
    %c0_20 = arith.constant 0 : index
    %c0_21 = arith.constant 0 : index
    %33 = vector.load %arg8[%c0_20, %c0_21] : memref<8x1xf32, #tpu.memory_space<vmem>>, vector<8x1xf32>
    tpu.vector_store %arg8[%c0_20, %c0_21], %32 {strides = array<i32>} : memref<8x1xf32, #tpu.memory_space<vmem>>, vector<8x1xf32>,
    return
  }
  func.func @transform_0(%arg0: i32) -> (i32, i32) {
    %c0_i32 = arith.constant 0 : i32
    %c0_i32_0 = arith.constant 0 : i32
    return %arg0, %c0_i32 : i32, i32
  }
  func.func @transform_1(%arg0: i32) -> (i32, i32) {
    %c0_i32 = arith.constant 0 : i32
    %c0_i32_0 = arith.constant 0 : i32
    %c0_i32_1 = arith.constant 0 : i32
    return %c0_i32, %c0_i32_0 : i32, i32
  }
  func.func @transform_2(%arg0: i32) -> (i32, i32) {
    %c0_i32 = arith.constant 0 : i32
    %c0_i32_0 = arith.constant 0 : i32
    %c0_i32_1 = arith.constant 0 : i32
    return %c0_i32, %c0_i32_0 : i32, i32
  }
  func.func @transform_3(%arg0: i32) -> (i32, i32) {
    %c0_i32 = arith.constant 0 : i32
    %c0_i32_0 = arith.constant 0 : i32
    %c0_i32_1 = arith.constant 0 : i32
    return %c0_i32, %c0_i32_0 : i32, i32
  }
  func.func @transform_4(%arg0: i32) -> (i32, i32) {
    %c0_i32 = arith.constant 0 : i32
    %c0_i32_0 = arith.constant 0 : i32
    %c0_i32_1 = arith.constant 0 : i32
    return %c0_i32, %c0_i32_0 : i32, i32
  }
  func.func @transform_5(%arg0: i32) -> (i32, i32) {
    %c0_i32 = arith.constant 0 : i32
    %c0_i32_0 = arith.constant 0 : i32
    %c0_i32_1 = arith.constant 0 : i32
    return %c0_i32, %c0_i32_0 : i32, i32
  }
  func.func @transform_6(%arg0: i32) -> (i32, i32) {
    %c0_i32 = arith.constant 0 : i32
    %c0_i32_0 = arith.constant 0 : i32
    %c0_i32_1 = arith.constant 0 : i32
    return %c0_i32, %c0_i32_0 : i32, i32
  }
  func.func @transform_7(%arg0: i32) -> (i32, i32) {
    %c0_i32 = arith.constant 0 : i32
    %c0_i32_0 = arith.constant 0 : i32
    return %arg0, %c0_i32 : i32, i32
  }
}

</mosaic_0001>

<bundles_post_ra>
// kernel: net_forward.1
= control target key start
LH: loop header
LB: loop body
LE: loop exit
PB: predicated region body
PF: predicated region fallthrough
CT: control target
= control target key end

     0   :  { %s394_s0 = inlined_call_operand.vmem [shape: f32[8,2], index: 0, kind: input, shape index: {}]   ;;  %s395_s1 = inlined_call_operand.vmem [shape: f32[2,128], index: 1, kind: input, shape index: {}]   ;;  %s396_s2 = inlined_call_operand.vmem [shape: f32[1,128], index: 2, kind: input, shape index: {}]   ;;  %s397_s3 = inlined_call_operand.hbm [shape: f32[128,128], index: 3, kind: input, shape index: {}]   ;;  %s398_s4 = inlined_call_operand.vmem [shape: f32[1,128], index: 4, kind: input, shape index: {}]   ;;  %s399_s5 = inlined_call_operand.vmem [shape: f32[1,128], index: 5, kind: input, shape index: {}]   ;;  %s400_s6 = inlined_call_operand.<no memory space> [shape: f32[1,1], index: 6, kind: input, shape index: {}]   ;;  %s401_s7 = inlined_call_operand.vmem [shape: f32[8,1], index: 7, kind: output, shape index: {}]  }
   0x1   :  { %v12_v0 = vstv %s400_s6 }
   0x2   :  { %13 = vst [vmem:[#allocation2] sm:$0x1] %v12_v0 }
   0x3   :  { %14 = vsyncpa [#allocation4], 0  ;;  %s310_s26 = smov [#allocation3]   ;;  %s286_s30 = scalar_lea.hbm %s397_s3, 2048 }
   0x4   :  { %s26_s27 = sshll.u32 %s310_s26, 4  ;;  %p287_p0 = scmp.ne.s32.totalorder %s397_s3, %s286_s30  ;;  %s27_s27 = int_to_ptr.vmem [resolvable:$true] %s26_s27 }
   0x5   :  { %p290_p1 = scmp.lt.u32.totalorder %s286_s30, %s397_s3 }
   0x7   :  { %p292_p2 = pnand %p290_p1, %p287_p0 }
   0x9   :  { %295 = shalt.err (!%p292_p2)
}
   0xa   :  { %s296_s6 = scalar_lea.vmem %s27_s27, 2048  ;;  %p301_p4 = scmp.lt.s32.totalorder %s27_s27, %s27_s27 }
   0xb   :  { %p297_p3 = scmp.ne.s32.totalorder %s27_s27, %s296_s6  ;;  %p302_p5 = scmp.lt.s32.totalorder %s296_s6, %s296_s6 }
   0xd   :  { %p303_p6 = por %p302_p5, %p301_p4 }
   0xf   :  { %p304_p7 = pnand %p303_p6, %p297_p3 }
  0x11   :  { %307 = shalt.err (!%p304_p7)
}
  0x12   :  { %s311_s12 = smov 128   ;;  %s312_s13 = smov 8  }
  0x13   :  { %32 = dma.hbm_to_vmem [thread:$0]  %s397_s3, 2048, %s27_s27, [#allocation4], %s311_s12, %s311_s12, %s312_s13  }
  0x14   :  { %308 = dma.done.wait [#allocation4], 2048  }
  0x15   :  { %309 = vsyncadd [#allocation4], 4294965248  ;;  %v313_v1 = vmov 0   ;;  %v314_v2 = vmov 0.0|0.0   ;;  %v42_v3 = vld [vmem:[%s394_s0] sm:$0xff]  ;;  %v75_v5 = vld [vmem:[#allocation3 + $0x8] sm:$0xff] }
  0x16   :  { %284 = vset.pattern.permute.xlu0 %v313_v1  ;;  %252 = vmatprep.subr.bf16.mxu0 %v314_v2  ;;  %v74_v4 = vld [vmem:[#allocation3] sm:$0xff]  ;;  %v76_v7 = vld [vmem:[#allocation3 + $0x10] sm:$0xff]  ;;  %v77_v8 = vld [vmem:[#allocation3 + $0x18] sm:$0xff]  ;;  %v315_v12 = vmov 1   ;;  %vm316_vm0 = vmmov 0   ;;  %v317_v16 = vmov 0.0  }
  0x17   :  { %46 = vperm.xlu0 %284, %v42_v3   ;;  %v253_v6 = vpack.c.bf16 %v75_v5, %v74_v4  ;;  %v256_v9 = vpack.c.bf16 %v77_v8, %v76_v7  ;;  %v78_v10 = vld [vmem:[#allocation3 + $0x20] sm:$0xff]  ;;  %v79_v11 = vld [vmem:[#allocation3 + $0x28] sm:$0xff]  ;;  %v80_v14 = vld [vmem:[#allocation3 + $0x30] sm:$0xff]  ;;  %249 = vmatprep.mubr.msk.f32.mxu0 %vm316_vm0, %v317_v16  ;;  %vm187_vm1 = vcmask 7168  }
  0x18   :  { %v259_v13 = vpack.c.bf16 %v79_v11, %v78_v10  ;;  %v81_v15 = vld [vmem:[#allocation3 + $0x38] sm:$0xff]  ;;  %v82_v18 = vld [vmem:[#allocation3 + $0x40] sm:$0xff]  ;;  %v83_v19 = vld [vmem:[#allocation3 + $0x48] sm:$0xff] }
  0x19   :  { %254 = vmatpush3.bf16.msra.mxu0 %v253_v6  ;;  %v262_v17 = vpack.c.bf16 %v81_v15, %v80_v14  ;;  %v265_v20 = vpack.c.bf16 %v83_v19, %v82_v18  ;;  %v84_v21 = vld [vmem:[#allocation3 + $0x50] sm:$0xff]  ;;  %v85_v22 = vld [vmem:[#allocation3 + $0x58] sm:$0xff]  ;;  %v86_v24 = vld [vmem:[#allocation3 + $0x60] sm:$0xff] }
  0x1a   :  { %255 = vmatprep.subr.bf16.mxu0 %v314_v2  ;;  %v268_v23 = vpack.c.bf16 %v85_v22, %v84_v21  ;;  %v87_v25 = vld [vmem:[#allocation3 + $0x68] sm:$0xff]  ;;  %v88_v27 = vld [vmem:[#allocation3 + $0x70] sm:$0xff]  ;;  %v89_v28 = vld [vmem:[#allocation3 + $0x78] sm:$0xff] }
  0x1b   :  { %285 = vset.pattern.permute.xlu0 %v315_v12  ;;  %v271_v26 = vpack.c.bf16 %v87_v25, %v86_v24  ;;  %v274_v29 = vpack.c.bf16 %v89_v28, %v88_v27  ;;  %v194_v31 = vld [vmem:[%s395_s1] ss:$0 sm:$0xff]  ;;  %v195_v32 = vld [vmem:[%s395_s1 + $0x1] ss:$0 sm:$0xff] }
  0x1c   :  { %56 = vperm.xlu0 %285, %v42_v3   ;;  %v196_v36 = vld [vmem:[%s396_s2] ss:$0 sm:$0xff] }
  0x1d   :  { %257 = vmatpush3.bf16.msra.mxu0 %v256_v9  ;;  %v197_v40 = vld [vmem:[%s398_s4] ss:$0 sm:$0xff] }
  0x1e   :  { %258 = vmatprep.subr.bf16.mxu0 %v314_v2  ;;  %v198_v44 = vld [vmem:[%s399_s5] ss:$0 sm:$0xff] }
  0x1f   :  { %v199_v47 = vld [vmem:[#allocation2] ss:$0 sm:$0xff] }
  0x21   :  { %260 = vmatpush3.bf16.msra.mxu0 %v259_v13 }
  0x22   :  { %261 = vmatprep.subr.bf16.mxu0 %v314_v2 }
  0x25   :  { %263 = vmatpush3.bf16.msra.mxu0 %v262_v17 }
  0x26   :  { %264 = vmatprep.subr.bf16.mxu0 %v314_v2 }
  0x29   :  { %266 = vmatpush3.bf16.msra.mxu0 %v265_v20 }
  0x2a   :  { %267 = vmatprep.subr.bf16.mxu0 %v314_v2 }
  0x2d   :  { %269 = vmatpush3.bf16.msra.mxu0 %v268_v23 }
  0x2e   :  { %270 = vmatprep.subr.bf16.mxu0 %v314_v2 }
  0x31   :  { %272 = vmatpush3.bf16.msra.mxu0 %v271_v26 }
  0x32   :  { %273 = vmatprep.subr.bf16.mxu0 %v314_v2 }
  0x35   :  { %275 = vmatpush3.bf16.msra.mxu0 %v274_v29 }
  0x96   :  { %v47_v30 = vpop.permute.xlu0 %46 }
  0x97   :  { %v53_v34 = vmul.f32 %v194_v31, %v47_v30 }
  0x9b   :  { %v57_v33 = vpop.permute.xlu0 %56 }
  0x9c   :  { %v63_v35 = vmul.f32 %v195_v32, %v57_v33 }
  0x9e   :  { %v64_v37 = vadd.f32 %v63_v35, %v53_v34 }
  0xa0   :  { %v72_v38 = vadd.f32 %v196_v36, %v64_v37 }
  0xa2   :  { %v73_v39 = vmax.f32 %v72_v38, 0.0 }
  0xa4   :  { %250 = vmatmul.mubr.f32.vlgmr.msra.gmra.mrb[0].mxu0 %v73_v39 }
 0x177   :  { %v163_v41 = vpop.f32.mrb[0].mxu0 }
 0x178   :  { %v164_v42 = vadd.f32 %v197_v40, %v163_v41  ;;  %v251_v43 = vpop.f32.mrb[1].mxu0 }
 0x17a   :  { %v167_v45 = vmax.f32 %v164_v42, 0.0 }
 0x17c   :  { %v175_v46 = vmul.f32 %v198_v44, %v167_v45 }
 0x17e   :  { %176 = vadd.xlane.f32.xlu1 %v175_v46 }
 0x20b   :  { %v177_v48 = vpop.xlane.xlu1 %176 }
 0x20c   :  { %v185_v49 = vadd.f32 %v199_v47, %v177_v48 }
 0x20e   :  { %v186_v50 = vmax.f32 %v185_v49, 0.0 }
 0x210   :  { %188 = vst.msk [vmem:[%s401_s7] sm:$0xff] %vm187_vm1, %v186_v50 }
 0x211   :  { %193 = vsyncpa [#allocation4], 1 }

</bundles_post_ra>
